<compile_context>
chip_gen: v6e
topology: v6e:2x2x1
jax: 0.10.0
libtpu: 0.0.40
codegen_flags: <defaults>
</compile_context>

<pallas_src>
import jax
import jax.numpy as jnp
from jax.experimental import pallas as pl
from jax.experimental.pallas import tpu as pltpu

CODE_SIZE = 200
LEAK = 0.2
K_PAD = 256        # first-matmul contraction dim padded 200 -> 256
TILE_B_MAX = 512   # per-tile rows; ~<=20 MiB VMEM at level 3, fits v5e/v6e/v7x


def _round_up(x, m):
    return (x + m - 1) // m * m


def _upsample_matrix(n):
    """0/1 matrix R of shape (n*n, (2n)*(2n)) such that flat_img @ R equals
    nearest-neighbor 2x upsampling of the (n, n) image, flattened row-major
    (matches F.interpolate(..., scale_factor=2) + .view(b, -1))."""
    m = 2 * n
    k = jnp.arange(m * m)
    src = (k // m // 2) * n + (k % m) // 2
    return jnp.zeros((n * n, m * m), jnp.float32).at[src, k].set(1.0)


def _lrelu(x):
    return jnp.where(x > 0, x, LEAK * x)


# ---------------------------------------------------------------------------
# Kernels (one per static level; weights are pre-folded in the wrapper)
# ---------------------------------------------------------------------------

def _kernel_level1(z_ref, w1_ref, b1_ref, s_ref, out_ref):
    # s = [cw, cb]
    h1 = jnp.dot(z_ref[...], w1_ref[...], preferred_element_type=jnp.float32)
    a1 = _lrelu(h1 + b1_ref[...])
    out_ref[...] = jnp.tanh(a1 * s_ref[0] + s_ref[1])


def _kernel_level2(z_ref, w1_ref, b1_ref, w2_ref, b2_ref, r8_ref, s_ref,
                   out_ref):
    # w2 = cw*W2 ; b2 = B2 + cb*colsum(W2) ; r8 = (1-alpha)*cw*R8
    # s  = [alpha*cw, cb]
    h1 = jnp.dot(z_ref[...], w1_ref[...], preferred_element_type=jnp.float32)
    a1 = _lrelu(h1 + b1_ref[...]).astype(jnp.bfloat16)
    h2 = jnp.dot(a1, w2_ref[...], preferred_element_type=jnp.float32)
    a2 = _lrelu(h2 + b2_ref[...])
    up = jnp.dot(a1, r8_ref[...], preferred_element_type=jnp.float32)
    out_ref[...] = jnp.tanh(up + a2 * s_ref[0] + s_ref[1])


def _kernel_level3(z_ref, w1_ref, b1_ref, w2_ref, b2_ref, w3_ref, b3_ref,
                   r16_ref, s_ref, out_ref):
    # w2/b2, w3/b3 carry the folded conv affine; r16 = (1-alpha)*cw*R16
    # s = [alpha*cw, cb]
    h1 = jnp.dot(z_ref[...], w1_ref[...], preferred_element_type=jnp.float32)
    a1 = _lrelu(h1 + b1_ref[...]).astype(jnp.bfloat16)
    h2 = jnp.dot(a1, w2_ref[...], preferred_element_type=jnp.float32)
    a2 = _lrelu(h2 + b2_ref[...]).astype(jnp.bfloat16)
    h3 = jnp.dot(a2, w3_ref[...], preferred_element_type=jnp.float32)
    a3 = _lrelu(h3 + b3_ref[...])
    up = jnp.dot(a2, r16_ref[...], preferred_element_type=jnp.float32)
    out_ref[...] = jnp.tanh(up + a3 * s_ref[0] + s_ref[1])


_KERNELS = {1: _kernel_level1, 2: _kernel_level2, 3: _kernel_level3}


# ---------------------------------------------------------------------------
# Wrapper
# ---------------------------------------------------------------------------

def generator_forward(z, params, level=3, alpha=0.0):
    if level not in (1, 2, 3):
        # The PyTorch module silently returns None for level 0; we refuse.
        raise ValueError("level must be 1, 2 or 3")
    alpha = float(alpha)
    batch, code = z.shape
    assert code == CODE_SIZE

    cw = params["cw"][0, 0]
    cb = params["cb"][0, 0]

    # ---- trace-time folding / padding (plain XLA ops, run once per call) ----
    out64 = 128 if level == 1 else 64           # pad level-1 lanes 64 -> 128
    w1 = jnp.zeros((K_PAD, out64), jnp.float32).at[:CODE_SIZE, :64].set(
        params["w1"]).astype(jnp.bfloat16)
    b1 = params["b1"]
    if level == 1:
        b1 = jnp.concatenate([b1, jnp.zeros((1, 64), jnp.float32)], axis=1)

    if level == 1:
        scalars = jnp.stack([cw, cb]).astype(jnp.float32)
        args = (w1, b1, scalars)
    else:
        w2f = (cw * params["w2"]).astype(jnp.bfloat16)
        b2f = params["b2"] + cb * params["w2"].sum(axis=0, keepdims=True)
        scalars = jnp.stack([alpha * cw, cb]).astype(jnp.float32)
        if level == 2:
            r8f = ((1.0 - alpha) * cw * _upsample_matrix(8)).astype(jnp.bfloat16)
            args = (w1, b1, w2f, b2f, r8f, scalars)
        else:
            w3f = (cw * params["w3"]).astype(jnp.bfloat16)
            b3f = params["b3"] + cb * params["w3"].sum(axis=0, keepdims=True)
            r16f = ((1.0 - alpha) * cw * _upsample_matrix(16)
                    ).astype(jnp.bfloat16)
            args = (w1, b1, w2f, b2f, w3f, b3f, r16f, scalars)

    # ---- batch tiling ----
    tile_b = min(TILE_B_MAX, _round_up(batch, 16))
    padded_batch = _round_up(batch, tile_b)
    grid = (padded_batch // tile_b,)
    zp = (jnp.zeros((padded_batch, K_PAD), jnp.float32)
          .at[:batch, :CODE_SIZE].set(z).astype(jnp.bfloat16))

    out_dim = {1: 128, 2: 256, 3: 1024}[level]

    def resident(a):
        return pl.BlockSpec(a.shape, lambda i: (0,) * a.ndim)

    in_specs = [pl.BlockSpec((tile_b, K_PAD), lambda i: (i, 0))]
    for a in args[:-1]:
        in_specs.append(resident(a))
    in_specs.append(pl.BlockSpec(memory_space=pltpu.MemorySpace.SMEM))

    out_specs = pl.BlockSpec((tile_b, out_dim), lambda i: (i, 0))

    macs = {1: CODE_SIZE * 64,
            2: CODE_SIZE * 64 + 2 * 64 * 256,
            3: CODE_SIZE * 64 + 64 * 256 + 2 * 256 * 1024}[level]
    weight_bytes = sum(int(a.size) * a.dtype.itemsize for a in args)
    cost = pl.CostEstimate(
        flops=2 * padded_batch * macs,
        transcendentals=padded_batch * out_dim,
        bytes_accessed=padded_batch * (K_PAD * 2 + out_dim * 4) + weight_bytes)

    out = pl.pallas_call(
        _KERNELS[level],
        out_shape=jax.ShapeDtypeStruct((padded_batch, out_dim), jnp.float32),
        grid=grid,
        in_specs=in_specs,
        out_specs=out_specs,
        compiler_params=pltpu.CompilerParams(
            dimension_semantics=("parallel",),
            vmem_limit_bytes=32 * 1024 * 1024),
        cost_estimate=cost,
    )(zp, *args)

    out = out[:batch]
    if level == 1:
        out = out[:, :64]
    return out


# ---------------------------------------------------------------------------
# Plain-JAX f32 reference (mirrors the PyTorch forward, eval mode)
# ---------------------------------------------------------------------------

def generator_ref(z, params, level=3, alpha=0.0):
    def up2x(x, n):
        b = x.shape[0]
        im = x.reshape(b, n, n)
        im = jnp.repeat(jnp.repeat(im, 2, axis=1), 2, axis=2)
        return im.reshape(b, -1)

    cw = params["cw"][0, 0]
    cb = params["cb"][0, 0]
    img8 = _lrelu(z @ params["w1"] + params["b1"]) * cw + cb
    if level == 1:
        return jnp.tanh(img8)
    img16 = _lrelu(img8 @ params["w2"] + params["b2"]) * cw + cb
    if level == 2:
        return jnp.tanh(up2x(img8, 8) * (1.0 - alpha) + img16 * alpha)
    img32 = _lrelu(img16 @ params["w3"] + params["b3"]) * cw + cb
    return jnp.tanh(up2x(img16, 16) * (1.0 - alpha) + img32 * alpha)


def init_params(key):
    """Deterministic init matching the PyTorch layer shapes
    (Linear: U(-1/sqrt(fan_in), 1/sqrt(fan_in)); Conv2d(1,1,1): U(-1, 1))."""
    ks = jax.random.split(key, 8)

    def linear(kw, kb, fan_in, fan_out):
        bound = 1.0 / (fan_in ** 0.5)
        w = jax.random.uniform(kw, (fan_in, fan_out), jnp.float32, -bound, bound)
        b = jax.random.uniform(kb, (1, fan_out), jnp.float32, -bound, bound)
        return w, b

    w1, b1 = linear(ks[0], ks[1], CODE_SIZE, 64)      # code2image
    w2, b2 = linear(ks[2], ks[3], 64, 256)            # linear_8_to_16
    w3, b3 = linear(ks[4], ks[5], 256, 1024)          # linear_16_to_32
    cw = jax.random.uniform(ks[6], (1, 1), jnp.float32, -1.0, 1.0)  # conv weight
    cb = jax.random.uniform(ks[7], (1, 1), jnp.float32, -1.0, 1.0)  # conv bias
    return dict(w1=w1, b1=b1, w2=w2, b2=b2, w3=w3, b3=b3, cw=cw, cb=cb)


if __name__ == "__main__":
    key = jax.random.PRNGKey(0)
    k_param, k_z = jax.random.split(key)
    params = init_params(k_param)

    batch = 2
    z = jax.random.normal(k_z, (batch, CODE_SIZE), jnp.float32)

    for level, alpha in ((1, 0.0), (2, 0.3), (3, 0.5)):
        out = generator_forward(z, params, level=level, alpha=alpha)
        out = jax.block_until_ready(out)
        ref = generator_ref(z, params, level=level, alpha=alpha)
        assert out.shape == ref.shape, (out.shape, ref.shape)
        # bf16 matmul operands (f32 accumulation) -> looser tolerance than f32.
        assert jnp.allclose(out, ref, atol=3e-2, rtol=0.0), (
            f"mismatch at level {level}: max err "
            f"{float(jnp.max(jnp.abs(out - ref)))}")

    print("KERNEL_OK")
</pallas_src>

<mosaic_0001>
module attributes {stable_mosaic.version = 11 : i64} {
  func.func @_kernel_level1(%arg0: i32, %arg1: memref<16x256xbf16, #tpu.memory_space<vmem>>, %arg2: memref<256x128xbf16, #tpu.memory_space<vmem>>, %arg3: memref<1x128xf32, #tpu.memory_space<vmem>>, %arg4: memref<2xf32, #tpu.memory_space<smem>>, %arg5: memref<16x128xf32, #tpu.memory_space<vmem>>) attributes {dimension_semantics = [#tpu.dimension_semantics<parallel>], iteration_bounds = array<i64: 1>, scalar_prefetch = 0 : i64, scratch_operands = 0 : i64, tpu.core_type = #tpu.core_type<tc>, window_params = [{transform_indices = @transform_0, window_bounds = array<i64: 16, 256>}, {pipeline_mode = #tpu.pipeline_mode<synchronous>, transform_indices = @transform_1, window_bounds = array<i64: 256, 128>}, {pipeline_mode = #tpu.pipeline_mode<synchronous>, transform_indices = @transform_2, window_bounds = array<i64: 1, 128>}, {transform_indices = @transform_3, window_bounds = array<i64: 2>}, {transform_indices = @transform_4, window_bounds = array<i64: 16, 128>}]} {
    %c0 = arith.constant 0 : index
    %c0_0 = arith.constant 0 : index
    %0 = vector.load %arg1[%c0, %c0_0] : memref<16x256xbf16, #tpu.memory_space<vmem>>, vector<16x256xbf16>
    %c0_1 = arith.constant 0 : index
    %c0_2 = arith.constant 0 : index
    %1 = vector.load %arg2[%c0_1, %c0_2] : memref<256x128xbf16, #tpu.memory_space<vmem>>, vector<256x128xbf16>
    %cst = arith.constant dense<0.000000e+00> : vector<16x128xf32>
    %2 = tpu.matmul %0, %1, %cst {dimension_numbers = #tpu.dot_dimension_numbers<[1], [0], [0], [1], [0, 0, 1, 1], [], []>} : vector<16x256xbf16>, vector<256x128xbf16>, vector<16x128xf32> -> vector<16x128xf32>
    %c0_3 = arith.constant 0 : index
    %c0_4 = arith.constant 0 : index
    %3 = vector.load %arg3[%c0_3, %c0_4] : memref<1x128xf32, #tpu.memory_space<vmem>>, vector<1x128xf32>
    %4 = vector.broadcast %3 : vector<1x128xf32> to vector<16x128xf32>
    %5 = arith.addf %2, %4 : vector<16x128xf32>
    %cst_5 = arith.constant 0.000000e+00 : f32
    %6 = vector.broadcast %cst_5 : f32 to vector<16x128xf32>
    %7 = arith.cmpf ogt, %5, %6 : vector<16x128xf32>
    %cst_6 = arith.constant 2.000000e-01 : f32
    %8 = vector.broadcast %cst_6 : f32 to vector<16x128xf32>
    %9 = arith.mulf %8, %5 : vector<16x128xf32>
    %10 = arith.select %7, %5, %9 : vector<16x128xi1>, vector<16x128xf32>
    %c0_7 = arith.constant 0 : index
    %11 = memref.load %arg4[%c0_7] : memref<2xf32, #tpu.memory_space<smem>>
    %12 = vector.broadcast %11 : f32 to vector<16x128xf32>
    %13 = arith.mulf %10, %12 : vector<16x128xf32>
    %c1 = arith.constant 1 : index
    %14 = memref.load %arg4[%c1] : memref<2xf32, #tpu.memory_space<smem>>
    %15 = vector.broadcast %14 : f32 to vector<16x128xf32>
    %16 = arith.addf %13, %15 : vector<16x128xf32>
    %17 = math.tanh %16 : vector<16x128xf32>
    %c0_8 = arith.constant 0 : index
    %c0_9 = arith.constant 0 : index
    %18 = vector.load %arg5[%c0_8, %c0_9] : memref<16x128xf32, #tpu.memory_space<vmem>>, vector<16x128xf32>
    tpu.vector_store %arg5[%c0_8, %c0_9], %17 {strides = array<i32>} : memref<16x128xf32, #tpu.memory_space<vmem>>, vector<16x128xf32>,
    return
  }
  func.func @transform_0(%arg0: i32) -> (i32, i32) {
    %c0_i32 = arith.constant 0 : i32
    %c0_i32_0 = arith.constant 0 : i32
    return %arg0, %c0_i32 : i32, i32
  }
  func.func @transform_1(%arg0: i32) -> (i32, i32) {
    %c0_i32 = arith.constant 0 : i32
    %c0_i32_0 = arith.constant 0 : i32
    %c0_i32_1 = arith.constant 0 : i32
    return %c0_i32, %c0_i32_0 : i32, i32
  }
  func.func @transform_2(%arg0: i32) -> (i32, i32) {
    %c0_i32 = arith.constant 0 : i32
    %c0_i32_0 = arith.constant 0 : i32
    %c0_i32_1 = arith.constant 0 : i32
    return %c0_i32, %c0_i32_0 : i32, i32
  }
  func.func @transform_3(%arg0: i32) -> i32 {
    %c0_i32 = arith.constant 0 : i32
    %c0_i32_0 = arith.constant 0 : i32
    return %c0_i32 : i32
  }
  func.func @transform_4(%arg0: i32) -> (i32, i32) {
    %c0_i32 = arith.constant 0 : i32
    %c0_i32_0 = arith.constant 0 : i32
    return %arg0, %c0_i32 : i32, i32
  }
}

</mosaic_0001>

<bundles_post_ra>
// kernel: tpu_custom_call.1
= control target key start
LH: loop header
LB: loop body
LE: loop exit
PB: predicated region body
PF: predicated region fallthrough
CT: control target
= control target key end

     0   :  { %9 = vsyncpa [#allocation3], 0  ;;  %s492_s0 = inlined_call_operand.hbm [shape: bf16[16,256], index: 0, kind: input, shape index: {}]   ;;  %s493_s1 = inlined_call_operand.hbm [shape: bf16[256,128], index: 1, kind: input, shape index: {}]   ;;  %s494_s2 = inlined_call_operand.vmem [shape: f32[1,128], index: 2, kind: input, shape index: {}]   ;;  %s495_s3 = inlined_call_operand.vmem [shape: f32[2], index: 3, kind: input, shape index: {}]   ;;  %s496_s4 = inlined_call_operand.hbm [shape: f32[16,128], index: 4, kind: output, shape index: {}]  }
   0x1   :  { %10 = vsyncpa [#allocation7], 0 }
   0x2   :  { %11 = vsyncpa [#allocation5], 0 }
   0x3   :  { %12 = vsyncpa [#allocation4], 0  ;;  %s438_s15 = smov [#allocation2]  }
   0x4   :  { %s18_s16 = sshll.u32 %s438_s15, 4  ;;  %s19_s16 = int_to_ptr.vmem [resolvable:$true] %s18_s16 }
   0x5   :  { %s366_s17 = scalar_lea.vmem %s19_s16, 256  ;;  %p371_p1 = scmp.lt.s32.totalorder %s19_s16, %s19_s16 }
   0x6   :  { %p367_p0 = scmp.ne.s32.totalorder %s19_s16, %s366_s17  ;;  %p372_p2 = scmp.lt.s32.totalorder %s366_s17, %s366_s17 }
   0x8   :  { %p373_p3 = por %p372_p2, %p371_p1 }
   0xa   :  { %p374_p4 = pnand %p373_p3, %p367_p0 }
   0xc   :  { %377 = shalt.err (!%p374_p4)
}
   0xd   :  { %s439_s18 = smov 128   ;;  %s440_s19 = smov 8  }
   0xe   :  { %24 = dma.hbm_to_vmem [thread:$0]  %s492_s0, 256, %s19_s16, [#allocation3], %s439_s18, %s439_s18, %s440_s19  }
   0xf   :  { %s441_s22 = smov [#allocation6]  }
  0x10   :  { %s30_s23 = sshll.u32 %s441_s22, 4  ;;  %s31_s23 = int_to_ptr.vmem [resolvable:$true] %s30_s23 }
  0x11   :  { %s386_s24 = scalar_lea.vmem %s31_s23, 2048  ;;  %p391_p6 = scmp.lt.s32.totalorder %s31_s23, %s31_s23 }
  0x12   :  { %p387_p5 = scmp.ne.s32.totalorder %s31_s23, %s386_s24  ;;  %p392_p7 = scmp.lt.s32.totalorder %s386_s24, %s386_s24 }
  0x14   :  { %p393_p8 = por %p392_p7, %p391_p6 }
  0x16   :  { %p394_p9 = pnand %p393_p8, %p387_p5 }
  0x18   :  { %397 = shalt.err (!%p394_p9)
}
  0x19   :  { %s442_s25 = smov 64   ;;  %s443_s26 = smov 4  }
  0x1a   :  { %36 = dma.hbm_to_vmem [thread:$0]  %s493_s1, 2048, %s31_s23, [#allocation7], %s442_s25, %s442_s25, %s443_s26  }
  0x1b   :  { %s45_s0 = sshll.u32 %s495_s3, 4  ;;  %s46_s0 = int_to_ptr.vmem [resolvable:$true] %s45_s0 }
  0x1c   :  { %s398_s5 = scalar_lea.vmem %s46_s0, 16  ;;  %p403_p11 = scmp.lt.s32.totalorder %s46_s0, %s46_s0 }
  0x1d   :  { %p399_p10 = scmp.ne.s32.totalorder %s46_s0, %s398_s5  ;;  %p404_p12 = scmp.lt.s32.totalorder %s398_s5, %s398_s5 }
  0x1f   :  { %p405_p13 = por %p404_p12, %p403_p11 }
  0x21   :  { %p406_p0 = pnand %p405_p13, %p399_p10 }
  0x23   :  { %409 = shalt.err (!%p406_p0)
}
  0x24   :  { %s444_s6 = smov [#allocation8]  }
  0x25   :  { %48 = dma.vmem_to_smem %s46_s0, 16, %s444_s6, [#allocation5]  }
  0x26   :  { %430 = dma.done.wait [#allocation3], 256  }
  0x27   :  { %431 = vsyncadd [#allocation3], 4294967040 }
  0x28   :  { %432 = dma.done.wait [#allocation7], 2048  }
  0x29   :  { %433 = vsyncadd [#allocation7], 4294965248 }
  0x2a   :  { %434 = dma.done.wait [#allocation5], 16  }
  0x2b   :  { %435 = vsyncadd [#allocation5], 4294967280 }
  0x2c   :  { %58 = sfence }
  0x2d   :  { %v335_v0 = vld [vmem:[#allocation6 + $0x78] sm:$0xff]   ;;  %v337_v2 = vld [vmem:[#allocation6 + $0x70] sm:$0xff]   ;;  %v339_v4 = vld [vmem:[#allocation6 + $0x68] sm:$0xff]   ;;  %s254_s1 = sld [smem:[#allocation8]] }
  0x2e   :  { %v336_v1 = vld [vmem:[#allocation6 + $0x38] sm:$0xff]   ;;  %305 = vmatprep.subr.bf16.mxu0 %v335_v0  ;;  %v338_v3 = vld [vmem:[#allocation6 + $0x30] sm:$0xff]   ;;  %v340_v5 = vld [vmem:[#allocation6 + $0x28] sm:$0xff]   ;;  %s304_s3 = sld [smem:[#allocation8 + $0x1]] }
  0x2f   :  { %306 = vmatpush3.bf16.msra.mxu0 %v336_v1  ;;  %v341_v6 = vld [vmem:[#allocation6 + $0x60] sm:$0xff]   ;;  %v343_v8 = vld [vmem:[#allocation6 + $0x58] sm:$0xff]   ;;  %v345_v10 = vld [vmem:[#allocation6 + $0x50] sm:$0xff]  }
  0x30   :  { %307 = vmatprep.subr.bf16.mxu0 %v337_v2  ;;  %v342_v7 = vld [vmem:[#allocation6 + $0x20] sm:$0xff]   ;;  %v344_v9 = vld [vmem:[#allocation6 + $0x18] sm:$0xff]   ;;  %v346_v12 = vld [vmem:[#allocation6 + $0x10] sm:$0xff]  }
  0x31   :  { %v353_v11 = vld [vmem:[#allocation2 + $0x4] ss:$8 sps:$4 sm:$0xff]   ;;  %v347_v13 = vld [vmem:[#allocation6 + $0x48] sm:$0xff]   ;;  %v349_v15 = vld [vmem:[#allocation6 + $0x40] sm:$0xff]  }
  0x32   :  { %239 = vmatprep.mubr.bf16.mxu0 %v353_v11  ;;  %v348_v14 = vld [vmem:[#allocation6 + $0x8] sm:$0xff]   ;;  %v350_v16 = vld [vmem:[#allocation6] sm:$0xff]   ;;  %v351_v17 = vld [vmem:[#allocation2] ss:$8 sps:$4 sm:$0xff]  }
  0x33   :  { %308 = vmatpush3.bf16.msra.mxu0 %v338_v3  ;;  %v285_v19 = vld [vmem:[%s494_s2] ss:$0 sm:$0xff]  ;;  %v255_v27 = vstv %s254_s1  ;;  %s445_s2 = smov [#allocation9]  }
  0x34   :  { %309 = vmatprep.subr.bf16.mxu0 %v339_v4  ;;  %v259_v30 = vstv %s304_s3  ;;  %s271_s9 = sshll.u32 %s445_s2, 4  ;;  %s272_s9 = int_to_ptr.vmem [resolvable:$true] %s271_s9 }
  0x35   :  { %s410_s10 = scalar_lea.vmem %s272_s9, 256  ;;  %p415_p2 = scmp.lt.s32.totalorder %s272_s9, %s272_s9 }
  0x36   :  { %p411_p1 = scmp.ne.s32.totalorder %s272_s9, %s410_s10  ;;  %p416_p3 = scmp.lt.s32.totalorder %s410_s10, %s410_s10 }
  0x37   :  { %310 = vmatpush3.bf16.msra.mxu0 %v340_v5 }
  0x38   :  { %311 = vmatprep.subr.bf16.mxu0 %v341_v6  ;;  %p417_p4 = por %p416_p3, %p415_p2 }
  0x3a   :  { %p418_p5 = pnand %p417_p4, %p411_p1 }
  0x3b   :  { %312 = vmatpush3.bf16.msra.mxu0 %v342_v7 }
  0x3c   :  { %313 = vmatprep.subr.bf16.mxu0 %v343_v8 }
  0x3f   :  { %314 = vmatpush3.bf16.msra.mxu0 %v344_v9 }
  0x40   :  { %315 = vmatprep.subr.bf16.mxu0 %v345_v10 }
  0x43   :  { %316 = vmatpush3.bf16.msra.mxu0 %v346_v12 }
  0x44   :  { %317 = vmatprep.subr.bf16.mxu0 %v347_v13 }
  0x47   :  { %318 = vmatpush3.bf16.msra.mxu0 %v348_v14 }
  0x48   :  { %319 = vmatprep.subr.bf16.mxu0 %v349_v15 }
  0x4b   :  { %320 = vmatpush3.bf16.msra.mxu0 %v350_v16 }
  0x4e   :  { %240 = vmatmul.mubr.bf16.vlgmr.msra.gmra.mxu0 %v351_v17 }
 0x10e   :  { %v321_v18 = vpop.f32.mrf.mxu0 }
 0x110   :  { %v322_v20 = vpop.f32.mrf.mxu0 }
 0x111   :  { %v323_v21 = vadd.f32 %v322_v20, %v321_v18 }
 0x112   :  { %v324_v22 = vpop.f32.mrf.mxu0 }
 0x113   :  { %v242_v23 = vadd.f32 %v323_v21, %v285_v19 }
 0x114   :  { %v325_v24 = vpop.f32.mrf.mxu0 }
 0x115   :  { %vm248_vm0 = vcmp.gt.f32.partialorder %v242_v23, 0.0  ;;  %v250_v25 = vmul.f32 0.2, %v242_v23  ;;  %v326_v26 = vadd.f32 %v325_v24, %v324_v22 }
 0x117   :  { %v252_v28 = vsel %vm248_vm0, %v242_v23, %v250_v25  ;;  %v245_v29 = vadd.f32 %v326_v26, %v285_v19 }
 0x118   :  { %v256_v31 = vmul.f32 %v255_v27, %v252_v28 }
 0x119   :  { %vm249_vm1 = vcmp.gt.f32.partialorder %v245_v29, 0.0  ;;  %v251_v32 = vmul.f32 0.2, %v245_v29 }
 0x11a   :  { %v260_v33 = vadd.f32 %v259_v30, %v256_v31 }
 0x11b   :  { %v253_v34 = vsel %vm249_vm1, %v245_v29, %v251_v32 }
 0x11c   :  { %v257_v35 = vmul.f32 %v255_v27, %v253_v34  ;;  %354 = vtanh.f32 %v260_v33 }
 0x11e   :  { %v261_v36 = vadd.f32 %v259_v30, %v257_v35 }
 0x120   :  { %356 = vtanh.f32 %v261_v36 }
 0x129   :  { %v355_v37 = vpop.eup %354 }
 0x12a   :  { %264 = vst [vmem:[#allocation9] sm:$0xff] %v355_v37 }
 0x12d   :  { %v357_v38 = vpop.eup %356 }
 0x12e   :  { %265 = vst [vmem:[#allocation9 + $0x8] sm:$0xff] %v357_v38 }
 0x12f   :  { %421 = shalt.err (!%p418_p5)
}
 0x130   :  { %277 = dma.vmem_to_hbm [thread:$0]  %s272_s9, 256, %s496_s4, [#allocation4], %s439_s18, %s439_s18, %s440_s19  }
 0x131   :  { %436 = dma.done.wait [#allocation4], 256  }
 0x132   :  { %437 = vsyncadd [#allocation4], 4294967040 }
 0x133   :  { %281 = vsyncpa [#allocation3], 1 }
 0x134   :  { %282 = vsyncpa [#allocation7], 1 }
 0x135   :  { %283 = vsyncpa [#allocation4], 1 }
 0x136   :  { %284 = vsyncpa [#allocation5], 1 }

</bundles_post_ra>
